<compile_context>
chip_gen: v7x
topology: tpu7x:2x2x1
jax: 0.10.0
libtpu: 0.0.40
codegen_flags: <defaults>
</compile_context>

<pallas_src>
import functools
import math

import jax
import jax.numpy as jnp
from jax import lax
from jax.experimental import pallas as pl
from jax.experimental.pallas import tpu as pltpu


def _round_up(a, b):
    return (a + b - 1) // b * b


# -----------------------------------------------------------------------------
# Kernel
# -----------------------------------------------------------------------------
def _adaln_scale_kernel(x_ref, cond_ref, mask_ref, wt_ref, b_ref, o_ref):
    # gamma = sigmoid(cond @ W^T + b), accumulated in f32 on the MXU.
    # cond: [tn, dim_cond], wt (pre-transposed): [dim_cond, td]  ->  z: [tn, td]
    z = lax.dot_general(
        cond_ref[...],
        wt_ref[...],
        dimension_numbers=(((1,), (0,)), ((), ())),
        preferred_element_type=jnp.float32,
    ) + b_ref[...].astype(jnp.float32)
    gamma = jax.nn.sigmoid(z)

    xv = x_ref[...]
    m = mask_ref[...].astype(xv.dtype)            # [tn, 1] broadcasts over td
    o_ref[...] = xv * gamma.astype(xv.dtype) * m


# -----------------------------------------------------------------------------
# Tiling / VMEM budgeting
# -----------------------------------------------------------------------------
def _vmem_budget_bytes():
    """Generation-aware (budget for tile sizing, scoped vmem limit)."""
    try:
        cap = int(pltpu.get_tpu_info().vmem_capacity_bytes)
    except Exception:
        cap = 64 * 1024 * 1024                      # conservative: v7x per-TC VMEM
    limit = min(cap - 16 * 1024 * 1024, 100 * 1024 * 1024)  # ~100 MiB v5e/v6e, ~48 MiB v7x
    limit = max(limit, 32 * 1024 * 1024)
    budget = limit - 8 * 1024 * 1024
    return budget, limit


def _select_tiles(n, dim, dim_cond, x_bytes, cond_bytes, mask_bytes, w_bytes,
                  budget_bytes, sublane):
    """Pick (tile_n, tile_d). Prefer tile_d == dim; shrink tile_n before tiling d."""

    def fixed_bytes(td):
        # Weight slice + bias slice, double-buffered by the pipeline.
        return 2 * (dim_cond * td * w_bytes + td * 4)

    def per_row_bytes(td):
        # x-in + out + cond tiles and lane-padded (x128) mask column, double-buffered,
        # plus f32 matmul result / sigmoid intermediates (~2 f32 tiles, single copy).
        return (2 * (2 * td * x_bytes + dim_cond * cond_bytes + 128 * mask_bytes)
                + 2 * td * 4)

    def max_rows(td):
        avail = budget_bytes - fixed_bytes(td)
        pr = per_row_bytes(td)
        if avail < sublane * pr:
            return 0
        t = (avail // pr // sublane) * sublane
        return int(min(t, 1024))

    # Preferred path: full feature dim resident -> contiguous DMAs, no re-reads.
    tn = max_rows(dim)
    if tn >= sublane:
        return int(min(tn, _round_up(n, sublane))), dim

    # Fallback for very large dim: tile the feature axis (multiples of 128 only).
    if dim % 128 == 0:
        td = max(128, ((dim // 2) // 128) * 128)
        while td > 128 and max_rows(td) < sublane:
            td = max(128, (td // 2 // 128) * 128)
        tn = max(max_rows(td), sublane)
        return int(min(tn, _round_up(n, sublane), 1024)), int(td)

    # dim not lane-aligned and huge: keep full dim, minimal token tile, let the
    # compiler manage (rare configuration).
    return int(min(sublane, _round_up(n, sublane))), dim


# -----------------------------------------------------------------------------
# Wrapper
# -----------------------------------------------------------------------------
@functools.partial(jax.jit, static_argnames=("tile_n", "tile_d"))
def adaptive_layernorm_output_scale(x, cond, mask, weight, bias, *,
                                    tile_n=None, tile_d=None):
    """x: [..., dim], cond: [..., dim_cond], mask: [...] -> [..., dim]."""
    orig_shape = x.shape
    dim = x.shape[-1]
    dim_cond = cond.shape[-1]
    n = int(math.prod(orig_shape[:-1])) if len(orig_shape) > 1 else 1

    # Low-precision activations: stream cond/weight at the same width (MXU still
    # accumulates in f32 via preferred_element_type).
    if x.dtype in (jnp.bfloat16, jnp.float16):
        cond = cond.astype(x.dtype)
        weight = weight.astype(x.dtype)

    # Metadata-only reshapes: flatten tokens; 2-D-ify mask/bias.
    x2 = x.reshape(n, dim)
    c2 = cond.reshape(n, dim_cond)
    if mask.dtype == jnp.bool_:
        mask = mask.astype(x.dtype)
    m2 = mask.reshape(n, 1)
    b2 = bias.reshape(1, dim)
    # One-time HBM transpose so the kernel never re-transposes the weight tile.
    wt = weight.T                                   # [dim_cond, dim]

    # ---- tile selection -----------------------------------------------------
    sublane = max(8, 32 // jnp.dtype(x.dtype).itemsize)   # 8 f32 / 16 bf16 / 32 int8
    budget, vmem_limit = _vmem_budget_bytes()

    auto_tn, auto_td = _select_tiles(
        n, dim, dim_cond,
        x_bytes=jnp.dtype(x.dtype).itemsize,
        cond_bytes=jnp.dtype(cond.dtype).itemsize,
        mask_bytes=jnp.dtype(m2.dtype).itemsize,
        w_bytes=jnp.dtype(weight.dtype).itemsize,
        budget_bytes=budget,
        sublane=sublane,
    )
    if tile_d is None:
        tile_d = auto_td
    tile_d = min(int(tile_d), dim)
    if tile_n is None:
        tile_n = auto_tn
    tile_n = int(_round_up(max(int(tile_n), sublane), sublane))

    num_n = pl.cdiv(n, tile_n)       # tail token block handled by masked writeback
    num_d = pl.cdiv(dim, tile_d)

    if num_d == 1:
        # 1-D grid: the token axis is the only (parallel) axis -> megacore splits it.
        grid = (num_n,)
        in_specs = [
            pl.BlockSpec((tile_n, dim), lambda i: (i, 0)),        # x tile
            pl.BlockSpec((tile_n, dim_cond), lambda i: (i, 0)),   # cond tile
            pl.BlockSpec((tile_n, 1), lambda i: (i, 0)),          # mask column
            pl.BlockSpec((dim_cond, dim), lambda i: (0, 0)),      # weight^T (resident)
            pl.BlockSpec((1, dim), lambda i: (0, 0)),             # bias (resident)
        ]
        out_specs = pl.BlockSpec((tile_n, dim), lambda i: (i, 0))
        dim_sem = ("parallel",)
    else:
        # Fallback: d innermost so cond/mask stay resident across the inner d loop.
        grid = (num_n, num_d)
        in_specs = [
            pl.BlockSpec((tile_n, tile_d), lambda i, j: (i, j)),      # x tile
            pl.BlockSpec((tile_n, dim_cond), lambda i, j: (i, 0)),    # cond (resident in j)
            pl.BlockSpec((tile_n, 1), lambda i, j: (i, 0)),           # mask (resident in j)
            pl.BlockSpec((dim_cond, tile_d), lambda i, j: (0, j)),    # weight^T slice
            pl.BlockSpec((1, tile_d), lambda i, j: (0, j)),           # bias slice
        ]
        out_specs = pl.BlockSpec((tile_n, tile_d), lambda i, j: (i, j))
        dim_sem = ("parallel", "arbitrary")

    out2 = pl.pallas_call(
        _adaln_scale_kernel,
        out_shape=jax.ShapeDtypeStruct((n, dim), x.dtype),
        grid_spec=pltpu.PrefetchScalarGridSpec(
            num_scalar_prefetch=0,
            grid=grid,
            in_specs=in_specs,
            out_specs=out_specs,
        ),
        compiler_params=pltpu.CompilerParams(
            dimension_semantics=dim_sem,
            vmem_limit_bytes=int(vmem_limit),
        ),
    )(x2, c2, m2, wt, b2)

    return out2.reshape(orig_shape)


# -----------------------------------------------------------------------------
# Reference + tests
# -----------------------------------------------------------------------------
def _reference(x, cond, mask, weight, bias):
    x32 = x.astype(jnp.float32)
    gamma = jax.nn.sigmoid(cond.astype(jnp.float32) @ weight.astype(jnp.float32).T
                           + bias.astype(jnp.float32))
    return (x32 * gamma * mask[..., None].astype(jnp.float32)).astype(x.dtype)


if __name__ == "__main__":
    adaln_zero_bias_init_value = -2.0

    # ---- Test 1: module-init parameters (zero weight, bias = -2) ------------
    batch, seq, dim, dim_cond = 2, 8, 32, 16
    kx, kc, km = jax.random.split(jax.random.PRNGKey(0), 3)
    x = jax.random.normal(kx, (batch, seq, dim), dtype=jnp.float32)
    cond = jax.random.normal(kc, (batch, seq, dim_cond), dtype=jnp.float32)
    mask = (jax.random.uniform(km, (batch, seq)) > 0.3).astype(jnp.float32)
    weight = jnp.zeros((dim, dim_cond), dtype=jnp.float32)
    bias = jnp.full((dim,), adaln_zero_bias_init_value, dtype=jnp.float32)

    out = jax.block_until_ready(adaptive_layernorm_output_scale(x, cond, mask, weight, bias))
    ref = _reference(x, cond, mask, weight, bias)
    assert out.shape == x.shape
    assert jnp.allclose(out, ref, atol=1e-5, rtol=1e-5), "mismatch vs reference (test 1)"

    # ---- Test 2: non-divisible token count, auto (default) tile, random W ---
    batch2, seq2 = 2, 9                          # N = 18 (exercises the tail block)
    kx2, kc2, km2, kw2 = jax.random.split(jax.random.PRNGKey(1), 4)
    x2 = jax.random.normal(kx2, (batch2, seq2, dim), dtype=jnp.float32)
    cond2 = jax.random.normal(kc2, (batch2, seq2, dim_cond), dtype=jnp.float32)
    mask2 = jax.random.uniform(km2, (batch2, seq2)) > 0.3     # bool mask
    weight2 = 0.1 * jax.random.normal(kw2, (dim, dim_cond), dtype=jnp.float32)

    out2 = jax.block_until_ready(
        adaptive_layernorm_output_scale(x2, cond2, mask2, weight2, bias))
    ref2 = _reference(x2, cond2, mask2, weight2, bias)
    assert jnp.allclose(out2, ref2, atol=1e-5, rtol=1e-5), "mismatch vs reference (test 2)"

    # ---- Test 3: bf16 activations (cond/weight downcast path) ---------------
    dim3, dim_cond3, n3b, n3s = 256, 128, 2, 24
    kx3, kc3, km3, kw3, kb3 = jax.random.split(jax.random.PRNGKey(2), 5)
    x3 = jax.random.normal(kx3, (n3b, n3s, dim3), dtype=jnp.bfloat16)
    cond3 = jax.random.normal(kc3, (n3b, n3s, dim_cond3), dtype=jnp.float32)
    mask3 = (jax.random.uniform(km3, (n3b, n3s)) > 0.3).astype(jnp.float32)
    weight3 = 0.05 * jax.random.normal(kw3, (dim3, dim_cond3), dtype=jnp.float32)
    bias3 = jnp.full((dim3,), adaln_zero_bias_init_value, dtype=jnp.float32)

    out3 = jax.block_until_ready(
        adaptive_layernorm_output_scale(x3, cond3, mask3, weight3, bias3))
    ref3 = _reference(x3, cond3.astype(jnp.bfloat16), mask3,
                      weight3.astype(jnp.bfloat16), bias3)
    assert jnp.allclose(out3.astype(jnp.float32), ref3.astype(jnp.float32),
                        atol=3e-2, rtol=3e-2), "mismatch vs reference (test 3)"

    print("KERNEL_OK")
</pallas_src>

<mosaic_0001>
module attributes {stable_mosaic.version = 11 : i64} {
  func.func @_adaln_scale_kernel(%arg0: i32, %arg1: memref<16x32xf32, #tpu.memory_space<vmem>>, %arg2: memref<16x16xf32, #tpu.memory_space<vmem>>, %arg3: memref<16x1xf32, #tpu.memory_space<vmem>>, %arg4: memref<16x32xf32, #tpu.memory_space<vmem>>, %arg5: memref<1x32xf32, #tpu.memory_space<vmem>>, %arg6: memref<16x32xf32, #tpu.memory_space<vmem>>) attributes {dimension_semantics = [#tpu.dimension_semantics<parallel>], iteration_bounds = array<i64: 1>, scalar_prefetch = 0 : i64, scratch_operands = 0 : i64, tpu.core_type = #tpu.core_type<tc>, window_params = [{transform_indices = @transform_0, window_bounds = array<i64: 16, 32>}, {transform_indices = @transform_1, window_bounds = array<i64: 16, 16>}, {transform_indices = @transform_2, window_bounds = array<i64: 16, 1>}, {pipeline_mode = #tpu.pipeline_mode<synchronous>, transform_indices = @transform_3, window_bounds = array<i64: 16, 32>}, {pipeline_mode = #tpu.pipeline_mode<synchronous>, transform_indices = @transform_4, window_bounds = array<i64: 1, 32>}, {transform_indices = @transform_5, window_bounds = array<i64: 16, 32>}]} {
    %c0 = arith.constant 0 : index
    %c0_0 = arith.constant 0 : index
    %0 = vector.load %arg2[%c0, %c0_0] : memref<16x16xf32, #tpu.memory_space<vmem>>, vector<16x16xf32>
    %c0_1 = arith.constant 0 : index
    %c0_2 = arith.constant 0 : index
    %1 = vector.load %arg4[%c0_1, %c0_2] : memref<16x32xf32, #tpu.memory_space<vmem>>, vector<16x32xf32>
    %cst = arith.constant dense<0.000000e+00> : vector<16x32xf32>
    %2 = tpu.matmul %0, %1, %cst {dimension_numbers = #tpu.dot_dimension_numbers<[1], [0], [0], [1], [0, 0, 1, 1], [], []>} : vector<16x16xf32>, vector<16x32xf32>, vector<16x32xf32> -> vector<16x32xf32>
    %c0_3 = arith.constant 0 : index
    %c0_4 = arith.constant 0 : index
    %3 = vector.load %arg5[%c0_3, %c0_4] : memref<1x32xf32, #tpu.memory_space<vmem>>, vector<1x32xf32>
    %4 = vector.broadcast %3 : vector<1x32xf32> to vector<16x32xf32>
    %5 = arith.addf %2, %4 : vector<16x32xf32>
    %6 = arith.negf %5 : vector<16x32xf32>
    %7 = math.exp %6 : vector<16x32xf32>
    %cst_5 = arith.constant 1.000000e+00 : f32
    %8 = vector.broadcast %cst_5 : f32 to vector<16x32xf32>
    %9 = arith.addf %8, %7 : vector<16x32xf32>
    %10 = arith.divf %8, %9 : vector<16x32xf32>
    %c0_6 = arith.constant 0 : index
    %c0_7 = arith.constant 0 : index
    %11 = vector.load %arg1[%c0_6, %c0_7] : memref<16x32xf32, #tpu.memory_space<vmem>>, vector<16x32xf32>
    %c0_8 = arith.constant 0 : index
    %c0_9 = arith.constant 0 : index
    %12 = vector.load %arg3[%c0_8, %c0_9] : memref<16x1xf32, #tpu.memory_space<vmem>>, vector<16x1xf32>
    %13 = arith.mulf %11, %10 : vector<16x32xf32>
    %14 = vector.broadcast %12 : vector<16x1xf32> to vector<16x32xf32>
    %15 = arith.mulf %13, %14 : vector<16x32xf32>
    %c0_10 = arith.constant 0 : index
    %c0_11 = arith.constant 0 : index
    %16 = vector.load %arg6[%c0_10, %c0_11] : memref<16x32xf32, #tpu.memory_space<vmem>>, vector<16x32xf32>
    tpu.vector_store %arg6[%c0_10, %c0_11], %15 {strides = array<i32>} : memref<16x32xf32, #tpu.memory_space<vmem>>, vector<16x32xf32>,
    return
  }
  func.func @transform_0(%arg0: i32) -> (i32, i32) {
    %c0_i32 = arith.constant 0 : i32
    %c0_i32_0 = arith.constant 0 : i32
    return %arg0, %c0_i32 : i32, i32
  }
  func.func @transform_1(%arg0: i32) -> (i32, i32) {
    %c0_i32 = arith.constant 0 : i32
    %c0_i32_0 = arith.constant 0 : i32
    return %arg0, %c0_i32 : i32, i32
  }
  func.func @transform_2(%arg0: i32) -> (i32, i32) {
    %c0_i32 = arith.constant 0 : i32
    %c0_i32_0 = arith.constant 0 : i32
    return %arg0, %c0_i32 : i32, i32
  }
  func.func @transform_3(%arg0: i32) -> (i32, i32) {
    %c0_i32 = arith.constant 0 : i32
    %c0_i32_0 = arith.constant 0 : i32
    %c0_i32_1 = arith.constant 0 : i32
    return %c0_i32, %c0_i32_0 : i32, i32
  }
  func.func @transform_4(%arg0: i32) -> (i32, i32) {
    %c0_i32 = arith.constant 0 : i32
    %c0_i32_0 = arith.constant 0 : i32
    %c0_i32_1 = arith.constant 0 : i32
    return %c0_i32, %c0_i32_0 : i32, i32
  }
  func.func @transform_5(%arg0: i32) -> (i32, i32) {
    %c0_i32 = arith.constant 0 : i32
    %c0_i32_0 = arith.constant 0 : i32
    return %arg0, %c0_i32 : i32, i32
  }
}

</mosaic_0001>

<bundles_post_ra>
// kernel: adaptive_layernorm_output_scale.1
= control target key start
LH: loop header
LB: loop body
LE: loop exit
PB: predicated region body
PF: predicated region fallthrough
CT: control target
= control target key end

     0   :  { %10 = vsyncpa [#allocation3], 0  ;;  %s346_s0 = inlined_call_operand.vmem [shape: f32[16,32], index: 0, kind: input, shape index: {}]   ;;  %s347_s1 = inlined_call_operand.vmem [shape: f32[16,16], index: 1, kind: input, shape index: {}]   ;;  %s348_s2 = inlined_call_operand.vmem [shape: f32[16,1], index: 2, kind: input, shape index: {}]   ;;  %s349_s3 = inlined_call_operand.hbm [shape: f32[16,32], index: 3, kind: input, shape index: {}]   ;;  %s350_s4 = inlined_call_operand.vmem [shape: f32[1,32], index: 4, kind: input, shape index: {}]   ;;  %s351_s5 = inlined_call_operand.hbm [shape: f32[16,32], index: 5, kind: output, shape index: {}]  }
   0x1   :  { %11 = vsyncpa [#allocation4], 0  ;;  %s260_s18 = smov [#allocation2]   ;;  %s212_s22 = scalar_lea.hbm %s349_s3, 256 }
   0x2   :  { %s23_s19 = sshll.u32 %s260_s18, 4  ;;  %p213_p0 = scmp.ne.s32.totalorder %s349_s3, %s212_s22  ;;  %s24_s19 = int_to_ptr.vmem [resolvable:$true] %s23_s19 }
   0x3   :  { %p216_p1 = scmp.lt.u32.totalorder %s212_s22, %s349_s3 }
   0x5   :  { %p218_p2 = pnand %p216_p1, %p213_p0 }
   0x7   :  { %221 = shalt.err (!%p218_p2)
}
   0x8   :  { %s222_s27 = scalar_lea.vmem %s24_s19, 256  ;;  %p227_p4 = scmp.lt.s32.totalorder %s24_s19, %s24_s19 }
   0x9   :  { %p223_p3 = scmp.ne.s32.totalorder %s24_s19, %s222_s27  ;;  %p228_p5 = scmp.lt.s32.totalorder %s222_s27, %s222_s27 }
   0xb   :  { %p229_p6 = por %p228_p5, %p227_p4 }
   0xd   :  { %p230_p7 = pnand %p229_p6, %p223_p3 }
   0xf   :  { %233 = shalt.err (!%p230_p7)
}
  0x10   :  { %s261_s28 = smov 128   ;;  %s262_s29 = smov 8  }
  0x11   :  { %29 = dma.hbm_to_vmem [thread:$0]  %s349_s3, 256, %s24_s19, [#allocation3], %s261_s28, %s261_s28, %s262_s29  }
  0x12   :  { %256 = dma.done.wait [#allocation3], 256  }
  0x13   :  { %257 = vsyncadd [#allocation3], 4294967040  ;;  %v263_v0 = vmov 0   ;;  %vm46_vm0 = vcmask 130048   ;;  %v37_v1 = vld [vmem:[#allocation2] sm:$0xff]  ;;  %v38_v2 = vld [vmem:[#allocation2 + $0x8] sm:$0xff] }
  0x14   :  { %203 = vset.pattern.permute.xlu0 %v263_v0  ;;  %v35_v3 = vld [vmem:[%s347_s1] sm:$0xff]  ;;  %v194_v4 = vpack.c.bf16 %v38_v2, %v37_v1  ;;  %v143_v6 = vld [vmem:[%s348_s2 + $0x8] sm:$0xff]  ;;  %s264_s17 = smov [#allocation5]   ;;  %vm158_vm1 = vcmask 261120  }
  0x15   :  { %191 = vmatprep.mubr.msk.f32.mxu0 %vm46_vm0, %v35_v3  ;;  %v142_v5 = vld [vmem:[%s348_s2] sm:$0xff]  ;;  %v36_v7 = vld [vmem:[%s347_s1 + $0x8] sm:$0xff]  ;;  %s166_s18 = sshll.u32 %s264_s17, 4  ;;  %s167_s18 = int_to_ptr.vmem [resolvable:$true] %s166_s18 }
  0x16   :  { %148 = vperm.xlu0 %203, %v142_v5   ;;  %195 = vmatprep.subr.bf16.mxu0 %v194_v4  ;;  %v178_v8 = vld [vmem:[%s350_s4] ss:$0 sm:$0xff]  ;;  %v141_v20 = vld [vmem:[%s346_s0 + $0x8] sm:$0xff]  ;;  %s234_s19 = scalar_lea.vmem %s167_s18, 256  ;;  %p239_p9 = scmp.lt.s32.totalorder %s167_s18, %s167_s18 }
  0x17   :  { %197 = vmatpush3.bf16.msra.mxu0 %v194_v4  ;;  %v140_v21 = vld [vmem:[%s346_s0] sm:$0xff]  ;;  %p235_p8 = scmp.ne.s32.totalorder %s167_s18, %s234_s19  ;;  %p240_p10 = scmp.lt.s32.totalorder %s234_s19, %s234_s19 }
  0x19   :  { %p241_p11 = por %p240_p10, %p239_p9 }
  0x1a   :  { %153 = vperm.xlu0 %203, %v143_v6   ;;  %192 = vmatmul.mubr.msk.f32.vlgmr.msra.gmra.mrb[0].mxu0 %vm46_vm0, %v36_v7 }
  0x1b   :  { %p242_p12 = pnand %p241_p11, %p235_p8 }
  0x95   :  { %v149_v19 = vpop.permute.xlu0 %148 }
  0x99   :  { %v154_v26 = vpop.permute.xlu0 %153 }
  0xed   :  { %v193_v9 = vpop.f32.mrb[0].mxu0 }
  0xee   :  { %v125_v10 = vadd.f32 %v193_v9, %v178_v8  ;;  %v119_v11 = vpop.f32.mrb[1].mxu0 }
  0xef   :  { %v120_v12 = vadd.f32 %v178_v8, %v119_v11 }
  0xf0   :  { %v182_v13 = vmul.f32 -1.442695, %v125_v10 }
  0xf1   :  { %v181_v14 = vmul.f32 -1.442695, %v120_v12 }
  0xf2   :  { %204 = vpow2.f32 %v182_v13 }
  0xf3   :  { %206 = vpow2.f32 %v181_v14 }
  0xfc   :  { %v205_v15 = vpop.eup %204 }
  0xfd   :  { %v207_v16 = vpop.eup %206  ;;  %v135_v17 = vadd.f32 1.0, %v205_v15 }
  0xfe   :  { %v134_v18 = vadd.f32 1.0, %v207_v16 }
  0xff   :  { %208 = vrcp.f32 %v135_v17 }
 0x100   :  { %210 = vrcp.f32 %v134_v18 }
 0x109   :  { %v209_v22 = vpop.eup %208 }
 0x10a   :  { %v211_v23 = vpop.eup %210  ;;  %v145_v24 = vmul.f32 %v209_v22, %v141_v20 }
 0x10b   :  { %v144_v25 = vmul.f32 %v211_v23, %v140_v21 }
 0x10c   :  { %v157_v27 = vmul.f32 %v154_v26, %v145_v24 }
 0x10d   :  { %v156_v28 = vmul.f32 %v149_v19, %v144_v25 }
 0x10e   :  { %160 = vst.msk [vmem:[#allocation5 + $0x8] sm:$0xff] %vm158_vm1, %v157_v27 }
 0x10f   :  { %159 = vst.msk [vmem:[#allocation5] sm:$0xff] %vm158_vm1, %v156_v28 }
 0x110   :  { %245 = shalt.err (!%p242_p12)
}
 0x111   :  { %s246_s21 = scalar_lea.hbm %s351_s5, 256 }
 0x112   :  { %p247_p13 = scmp.ne.s32.totalorder %s351_s5, %s246_s21  ;;  %p250_p0 = scmp.lt.u32.totalorder %s246_s21, %s351_s5 }
 0x114   :  { %p252_p1 = pnand %p250_p0, %p247_p13 }
 0x116   :  { %255 = shalt.err (!%p252_p1)
}
 0x117   :  { %172 = dma.vmem_to_hbm [thread:$0]  %s167_s18, 256, %s351_s5, [#allocation4], %s261_s28, %s261_s28, %s262_s29  }
 0x118   :  { %258 = dma.done.wait [#allocation4], 256  }
 0x119   :  { %259 = vsyncadd [#allocation4], 4294967040 }
 0x11a   :  { %176 = vsyncpa [#allocation3], 1 }
 0x11b   :  { %177 = vsyncpa [#allocation4], 1 }

</bundles_post_ra>
